<compile_context>
chip_gen: v7x
topology: tpu7x:2x2x1
jax: 0.10.0
libtpu: 0.0.40
codegen_flags: <defaults>
</compile_context>

<pallas_src>
import numpy as np
import jax
import jax.numpy as jnp
from jax.experimental import pallas as pl
from jax.experimental.pallas import tpu as pltpu


def _round_up(x, m):
    return ((x + m - 1) // m) * m


def _sgcn2_kernel(s_dst_ref, s_src_ref, d_dst_ref, adj_ref, h_ref, z_ref, acc_ref):
    k = pl.program_id(1)

    @pl.when(k == 0)
    def _():
        acc_ref[...] = jnp.zeros_like(acc_ref)

    # alpha[t,s] = tanh(s_dst[t] + s_src[s])   (gate bias already folded into s_dst)
    alpha = jnp.tanh(s_dst_ref[...] + s_src_ref[...])                    # (tm, tk) f32
    # e[t,s] = alpha * w[t,s]  -- degree scaling was hoisted out of the N^2 path.
    # TODO(synk): nn.Dropout on e is stochastic; implemented as eval-mode identity
    # (training mode would need pltpu.prng_seed / prng_random_bits + rescale).
    e = (alpha * adj_ref[...].astype(jnp.float32)).astype(jnp.bfloat16)  # (tm, tk)
    # partial z[t] += sum_s e[t,s] * (d[s] * h[s])   -- bf16 MXU, f32 accumulate
    acc_ref[...] += jnp.dot(e, h_ref[...], preferred_element_type=jnp.float32)

    @pl.when(k == pl.num_programs(1) - 1)
    def _():
        z_ref[...] = (acc_ref[...] * d_dst_ref[...]).astype(z_ref.dtype)


def spectral_sgcn2(h, gate_w, gate_b, d, adj, *, tm=256, tk=512):
    """h: (N, D) node features; gate_w: (1, 2D); gate_b: (1,);
    d: (N,) per-node degree normalizer; adj: (N, N) dense edge weights (dst, src)."""
    N, D = h.shape
    h = h.astype(jnp.float32)
    d = d.astype(jnp.float32)
    adj = adj.astype(jnp.float32)
    w_dst = gate_w[:, :D].astype(jnp.float32)       # applies to edges.dst['h']
    w_src = gate_w[:, D:].astype(jnp.float32)       # applies to edges.src['h']

    # Rank-1 gate scores computed once in XLA (tiny GEMVs), bias folded in.
    s_dst = h @ w_dst.T + gate_b.astype(jnp.float32)[0]     # (N, 1)
    s_src = (h @ w_src.T).T                                  # (1, N)
    # Fold src-degree into h; dst-degree is applied at finalize inside the kernel.
    h_scaled = d[:, None] * h                                # (N, D)

    # Padding: lane-dense feature dim, (8,128)-friendly / MXU-friendly tiles.
    D_pad = _round_up(D, 128)
    N_pad = _round_up(N, 128)
    tm_eff = min(tm, N_pad)
    tk_eff = min(tk, N_pad)
    N_pad = _round_up(N_pad, int(np.lcm(tm_eff, tk_eff)))

    s_dst_p = jnp.pad(s_dst, ((0, N_pad - N), (0, 0)))
    s_src_p = jnp.pad(s_src, ((0, 0), (0, N_pad - N)))
    d_dst_p = jnp.pad(d[:, None], ((0, N_pad - N), (0, 0)))
    adj_p = jnp.pad(adj, ((0, N_pad - N), (0, N_pad - N))).astype(jnp.bfloat16)
    h_p = jnp.pad(h_scaled, ((0, N_pad - N), (0, D_pad - D))).astype(jnp.bfloat16)

    grid = (N_pad // tm_eff, N_pad // tk_eff)

    cost = pl.CostEstimate(
        flops=2 * N_pad * N_pad * D_pad + 2 * N_pad * N_pad,
        transcendentals=N_pad * N_pad,
        bytes_accessed=(adj_p.size * 2) + (h_p.size * 2) + (N_pad * D_pad * 4),
    )

    z_pad = pl.pallas_call(
        _sgcn2_kernel,
        out_shape=jax.ShapeDtypeStruct((N_pad, D_pad), jnp.float32),
        grid_spec=pltpu.PrefetchScalarGridSpec(
            num_scalar_prefetch=0,
            grid=grid,
            in_specs=[
                pl.BlockSpec((tm_eff, 1), lambda i, k: (i, 0)),        # s_dst (+ bias)
                pl.BlockSpec((1, tk_eff), lambda i, k: (0, k)),        # s_src row
                pl.BlockSpec((tm_eff, 1), lambda i, k: (i, 0)),        # d_dst
                pl.BlockSpec((tm_eff, tk_eff), lambda i, k: (i, k)),   # adj (bf16)
                pl.BlockSpec((tk_eff, D_pad), lambda i, k: (k, 0)),    # d*h   (bf16)
            ],
            out_specs=pl.BlockSpec((tm_eff, D_pad), lambda i, k: (i, 0)),
            scratch_shapes=[pltpu.VMEM((tm_eff, D_pad), jnp.float32)],
        ),
        compiler_params=pltpu.CompilerParams(
            dimension_semantics=("parallel", "arbitrary"),
        ),
        cost_estimate=cost,
    )(s_dst_p, s_src_p, d_dst_p, adj_p, h_p)

    return z_pad[:N, :D]


def reference(h, gate_w, gate_b, d, adj):
    N, D = h.shape
    s_dst = h @ gate_w[:, :D].T          # (N, 1)
    s_src = h @ gate_w[:, D:].T          # (N, 1)
    alpha = jnp.tanh(s_dst + s_src.T + gate_b[0])
    e = alpha * d[:, None] * d[None, :] * adj
    return e @ h


if __name__ == "__main__":
    key = jax.random.PRNGKey(0)
    N, D = 16, 32                        # N nodes, in_dim = 32

    k_h, k_w, k_b, k_adj, k_ew = jax.random.split(key, 5)

    h = jax.random.normal(k_h, (N, D), dtype=jnp.float32)

    # gate = nn.Linear(2*in_dim, 1), xavier_normal_(gain=1.414) on weight
    fan_in, fan_out = 2 * D, 1
    std = 1.414 * np.sqrt(2.0 / (fan_in + fan_out))
    gate_w = std * jax.random.normal(k_w, (1, 2 * D), dtype=jnp.float32)
    gate_b = 0.1 * jax.random.normal(k_b, (1,), dtype=jnp.float32)

    # deterministic random graph: adj[t, s] = edge weight w for edge s->t, else 0
    mask = (jax.random.uniform(k_adj, (N, N)) < 0.3).astype(jnp.float32)
    edge_w = jax.random.uniform(k_ew, (N, N), dtype=jnp.float32)
    adj = mask * edge_w

    # per-node degree normalizer d (ndata['d']): 1/sqrt(in-degree + 1)
    deg = jnp.sum(mask, axis=1) + 1.0
    d = 1.0 / jnp.sqrt(deg)

    z = spectral_sgcn2(h, gate_w, gate_b, d, adj)
    z = jax.block_until_ready(z)

    z_ref = reference(h, gate_w, gate_b, d, adj)
    # bf16 adj/h streaming -> looser tolerance than the pure-f32 reference.
    np.testing.assert_allclose(np.asarray(z), np.asarray(z_ref), rtol=3e-2, atol=3e-2)

    print("KERNEL_OK")
</pallas_src>

<mosaic_0001>
module attributes {stable_mosaic.version = 11 : i64} {
  func.func @_sgcn2_kernel(%arg0: i32, %arg1: i32, %arg2: memref<128x1xf32, #tpu.memory_space<vmem>>, %arg3: memref<1x128xf32, #tpu.memory_space<vmem>>, %arg4: memref<128x1xf32, #tpu.memory_space<vmem>>, %arg5: memref<128x128xbf16, #tpu.memory_space<vmem>>, %arg6: memref<128x128xbf16, #tpu.memory_space<vmem>>, %arg7: memref<128x128xf32, #tpu.memory_space<vmem>>, %arg8: memref<128x128xf32, #tpu.memory_space<vmem>>) attributes {dimension_semantics = [#tpu.dimension_semantics<parallel>, #tpu.dimension_semantics<arbitrary>], iteration_bounds = array<i64: 1, 1>, scalar_prefetch = 0 : i64, scratch_operands = 1 : i64, tpu.core_type = #tpu.core_type<tc>, window_params = [{transform_indices = @transform_0, window_bounds = array<i64: 128, 1>}, {transform_indices = @transform_1, window_bounds = array<i64: 1, 128>}, {transform_indices = @transform_2, window_bounds = array<i64: 128, 1>}, {transform_indices = @transform_3, window_bounds = array<i64: 128, 128>}, {transform_indices = @transform_4, window_bounds = array<i64: 128, 128>}, {transform_indices = @transform_5, window_bounds = array<i64: 128, 128>}]} {
    %c0_i32 = arith.constant 0 : i32
    %0 = arith.cmpi eq, %arg1, %c0_i32 : i32
    %1 = arith.extui %0 : i1 to i32
    %c0_i32_0 = arith.constant 0 : i32
    %2 = arith.cmpi ne, %1, %c0_i32_0 : i32
    scf.if %2 {
      %cst_14 = arith.constant 0.000000e+00 : f32
      %21 = vector.broadcast %cst_14 : f32 to vector<128x128xf32>
      %c0_15 = arith.constant 0 : index
      %c0_16 = arith.constant 0 : index
      %22 = vector.load %arg8[%c0_15, %c0_16] : memref<128x128xf32, #tpu.memory_space<vmem>>, vector<128x128xf32>
      tpu.vector_store %arg8[%c0_15, %c0_16], %21 {strides = array<i32>} : memref<128x128xf32, #tpu.memory_space<vmem>>, vector<128x128xf32>,
    } else {
    }
    %c0 = arith.constant 0 : index
    %c0_1 = arith.constant 0 : index
    %3 = vector.load %arg2[%c0, %c0_1] : memref<128x1xf32, #tpu.memory_space<vmem>>, vector<128x1xf32>
    %c0_2 = arith.constant 0 : index
    %c0_3 = arith.constant 0 : index
    %4 = vector.load %arg3[%c0_2, %c0_3] : memref<1x128xf32, #tpu.memory_space<vmem>>, vector<1x128xf32>
    %5 = vector.broadcast %3 : vector<128x1xf32> to vector<128x128xf32>
    %6 = vector.broadcast %4 : vector<1x128xf32> to vector<128x128xf32>
    %7 = arith.addf %5, %6 : vector<128x128xf32>
    %8 = math.tanh %7 : vector<128x128xf32>
    %c0_4 = arith.constant 0 : index
    %c0_5 = arith.constant 0 : index
    %9 = vector.load %arg5[%c0_4, %c0_5] : memref<128x128xbf16, #tpu.memory_space<vmem>>, vector<128x128xbf16>
    %10 = arith.extf %9 : vector<128x128xbf16> to vector<128x128xf32>
    %11 = arith.mulf %8, %10 : vector<128x128xf32>
    %12 = arith.truncf %11 : vector<128x128xf32> to vector<128x128xbf16>
    %c0_6 = arith.constant 0 : index
    %c0_7 = arith.constant 0 : index
    %13 = vector.load %arg8[%c0_6, %c0_7] : memref<128x128xf32, #tpu.memory_space<vmem>>, vector<128x128xf32>
    %c0_8 = arith.constant 0 : index
    %c0_9 = arith.constant 0 : index
    %14 = vector.load %arg6[%c0_8, %c0_9] : memref<128x128xbf16, #tpu.memory_space<vmem>>, vector<128x128xbf16>
    %cst = arith.constant dense<0.000000e+00> : vector<128x128xf32>
    %15 = tpu.matmul %12, %14, %cst {dimension_numbers = #tpu.dot_dimension_numbers<[1], [0], [0], [1], [0, 0, 1, 1], [], []>} : vector<128x128xbf16>, vector<128x128xbf16>, vector<128x128xf32> -> vector<128x128xf32>
    %16 = arith.addf %13, %15 : vector<128x128xf32>
    %c0_10 = arith.constant 0 : index
    %c0_11 = arith.constant 0 : index
    %17 = vector.load %arg8[%c0_10, %c0_11] : memref<128x128xf32, #tpu.memory_space<vmem>>, vector<128x128xf32>
    tpu.vector_store %arg8[%c0_10, %c0_11], %16 {strides = array<i32>} : memref<128x128xf32, #tpu.memory_space<vmem>>, vector<128x128xf32>,
    %c0_i32_12 = arith.constant 0 : i32
    %18 = arith.cmpi eq, %arg1, %c0_i32_12 : i32
    %19 = arith.extui %18 : i1 to i32
    %c0_i32_13 = arith.constant 0 : i32
    %20 = arith.cmpi ne, %19, %c0_i32_13 : i32
    scf.if %20 {
      %c0_14 = arith.constant 0 : index
      %c0_15 = arith.constant 0 : index
      %21 = vector.load %arg8[%c0_14, %c0_15] : memref<128x128xf32, #tpu.memory_space<vmem>>, vector<128x128xf32>
      %c0_16 = arith.constant 0 : index
      %c0_17 = arith.constant 0 : index
      %22 = vector.load %arg4[%c0_16, %c0_17] : memref<128x1xf32, #tpu.memory_space<vmem>>, vector<128x1xf32>
      %23 = vector.broadcast %22 : vector<128x1xf32> to vector<128x128xf32>
      %24 = arith.mulf %21, %23 : vector<128x128xf32>
      %c0_18 = arith.constant 0 : index
      %c0_19 = arith.constant 0 : index
      %25 = vector.load %arg7[%c0_18, %c0_19] : memref<128x128xf32, #tpu.memory_space<vmem>>, vector<128x128xf32>
      tpu.vector_store %arg7[%c0_18, %c0_19], %24 {strides = array<i32>} : memref<128x128xf32, #tpu.memory_space<vmem>>, vector<128x128xf32>,
    } else {
    }
    return
  }
  func.func @transform_0(%arg0: i32, %arg1: i32) -> (i32, i32) {
    %c0_i32 = arith.constant 0 : i32
    %c0_i32_0 = arith.constant 0 : i32
    return %arg0, %c0_i32 : i32, i32
  }
  func.func @transform_1(%arg0: i32, %arg1: i32) -> (i32, i32) {
    %c0_i32 = arith.constant 0 : i32
    %c0_i32_0 = arith.constant 0 : i32
    return %c0_i32, %arg1 : i32, i32
  }
  func.func @transform_2(%arg0: i32, %arg1: i32) -> (i32, i32) {
    %c0_i32 = arith.constant 0 : i32
    %c0_i32_0 = arith.constant 0 : i32
    return %arg0, %c0_i32 : i32, i32
  }
  func.func @transform_3(%arg0: i32, %arg1: i32) -> (i32, i32) {
    %c0_i32 = arith.constant 0 : i32
    return %arg0, %arg1 : i32, i32
  }
  func.func @transform_4(%arg0: i32, %arg1: i32) -> (i32, i32) {
    %c0_i32 = arith.constant 0 : i32
    %c0_i32_0 = arith.constant 0 : i32
    return %arg1, %c0_i32 : i32, i32
  }
  func.func @transform_5(%arg0: i32, %arg1: i32) -> (i32, i32) {
    %c0_i32 = arith.constant 0 : i32
    %c0_i32_0 = arith.constant 0 : i32
    return %arg0, %c0_i32 : i32, i32
  }
}

</mosaic_0001>

<bundles_post_ra>
// kernel: tpu_custom_call.1
= control target key start
LH: loop header
LB: loop body
LE: loop exit
PB: predicated region body
PF: predicated region fallthrough
CT: control target
= control target key end

     0   :  { %v787_v2 = vmov 0   ;;  %s998_s0 = inlined_call_operand.vmem [shape: f32[128,1], index: 0, kind: input, shape index: {}]   ;;  %s999_s1 = inlined_call_operand.vmem [shape: f32[1,128], index: 1, kind: input, shape index: {}]   ;;  %s1000_s2 = inlined_call_operand.vmem [shape: f32[128,1], index: 2, kind: input, shape index: {}]   ;;  %s1001_s3 = inlined_call_operand.vmem [shape: bf16[128,128], index: 3, kind: input, shape index: {}]   ;;  %s1002_s4 = inlined_call_operand.vmem [shape: bf16[128,128], index: 4, kind: input, shape index: {}]   ;;  %s1003_s5 = inlined_call_operand.hbm [shape: f32[128,128], index: 5, kind: output, shape index: {}]  }
   0x1   :  { %v50_v0 = vld [vmem:[%s998_s0 + $0x40] sm:$0xff]  ;;  %722 = vset.pattern.permute.xlu1 %v787_v2  ;;  %721 = vset.pattern.permute.xlu0 %v787_v2  ;;  %v51_v3 = vld [vmem:[%s998_s0 + $0x48] sm:$0xff]  ;;  %v45_v5 = vld [vmem:[%s998_s0 + $0x18] sm:$0xff] }
   0x2   :  { %v42_v1 = vld [vmem:[%s998_s0] sm:$0xff]  ;;  %101 = vperm.xlu1 %722, %v50_v0   ;;  %v43_v4 = vld [vmem:[%s998_s0 + $0x8] sm:$0xff]  ;;  %v44_v6 = vld [vmem:[%s998_s0 + $0x10] sm:$0xff] }
   0x3   :  { %61 = vperm.xlu0 %721, %v42_v1   ;;  %v53_v7 = vld [vmem:[%s998_s0 + $0x58] sm:$0xff]  ;;  %v52_v8 = vld [vmem:[%s998_s0 + $0x50] sm:$0xff]  ;;  %v723_v9 = vld [vmem:[%s1002_s4] sm:$0xff]  }
   0x4   :  { %v724_v10 = vld [vmem:[%s1002_s4 + $0x8] sm:$0xff]   ;;  %669 = vmatprep.subr.bf16.mxu0 %v723_v9  ;;  %701 = vmatprep.subr.bf16.mxu1 %v723_v9  ;;  %v46_v12 = vld [vmem:[%s998_s0 + $0x20] sm:$0xff]  ;;  %v725_v13 = vld [vmem:[%s1002_s4 + $0x10] sm:$0xff]  }
   0x5   :  { %v47_v11 = vld [vmem:[%s998_s0 + $0x28] sm:$0xff]  ;;  %670 = vmatpush3.bf16.msra.mxu0 %v723_v9  ;;  %709 = vmatpush3.bf16.msra.mxu1 %v723_v9  ;;  %v54_v15 = vld [vmem:[%s998_s0 + $0x60] sm:$0xff] }
   0x6   :  { %106 = vperm.xlu1 %722, %v51_v3   ;;  %671 = vmatprep.subr.bf16.mxu0 %v724_v10  ;;  %v55_v14 = vld [vmem:[%s998_s0 + $0x68] sm:$0xff] }
   0x7   :  { %66 = vperm.xlu0 %721, %v43_v4   ;;  %702 = vmatprep.subr.bf16.mxu1 %v724_v10 }
   0x9   :  { %672 = vmatpush3.bf16.msra.mxu0 %v724_v10  ;;  %710 = vmatpush3.bf16.msra.mxu1 %v724_v10 }
   0xa   :  { %76 = vperm.xlu1 %722, %v45_v5  }
   0xb   :  { %71 = vperm.xlu0 %721, %v44_v6  }
   0xe   :  { %116 = vperm.xlu1 %722, %v53_v7  }
   0xf   :  { %111 = vperm.xlu0 %721, %v52_v8  }
  0x12   :  { %86 = vperm.xlu1 %722, %v47_v11  }
  0x13   :  { %81 = vperm.xlu0 %721, %v46_v12  }
  0x14   :  { %10 = vsyncpa [#allocation4], 0  ;;  %673 = vmatprep.subr.bf16.mxu0 %v725_v13  ;;  %703 = vmatprep.subr.bf16.mxu1 %v725_v13  ;;  %v726_v16 = vld [vmem:[%s1002_s4 + $0x18] sm:$0xff]   ;;  %v48_v18 = vld [vmem:[%s998_s0 + $0x30] sm:$0xff] }
  0x15   :  { %v49_v17 = vld [vmem:[%s998_s0 + $0x38] sm:$0xff]  ;;  %674 = vmatpush3.bf16.msra.mxu0 %v725_v13  ;;  %711 = vmatpush3.bf16.msra.mxu1 %v725_v13  ;;  %v727_v19 = vld [vmem:[%s1002_s4 + $0x20] sm:$0xff]   ;;  %v56_v21 = vld [vmem:[%s998_s0 + $0x70] sm:$0xff] }
  0x16   :  { %126 = vperm.xlu1 %722, %v55_v14   ;;  %675 = vmatprep.subr.bf16.mxu0 %v726_v16  ;;  %v57_v20 = vld [vmem:[%s998_s0 + $0x78] sm:$0xff]  ;;  %v728_v22 = vld [vmem:[%s1002_s4 + $0x28] sm:$0xff]   ;;  %v461_v24 = vld [vmem:[%s1000_s2] sm:$0xff] }
  0x17   :  { %121 = vperm.xlu0 %721, %v54_v15   ;;  %704 = vmatprep.subr.bf16.mxu1 %v726_v16  ;;  %v462_v23 = vld [vmem:[%s1000_s2 + $0x8] sm:$0xff]  ;;  %v729_v25 = vld [vmem:[%s1002_s4 + $0x30] sm:$0xff]   ;;  %v464_v26 = vld [vmem:[%s1000_s2 + $0x18] sm:$0xff] }
  0x18   :  { %v463_v27 = vld [vmem:[%s1000_s2 + $0x10] sm:$0xff]  ;;  %v730_v28 = vld [vmem:[%s1002_s4 + $0x38] sm:$0xff]   ;;  %v466_v29 = vld [vmem:[%s1000_s2 + $0x28] sm:$0xff] }
  0x19   :  { %676 = vmatpush3.bf16.msra.mxu0 %v726_v16  ;;  %712 = vmatpush3.bf16.msra.mxu1 %v726_v16  ;;  %v465_v30 = vld [vmem:[%s1000_s2 + $0x20] sm:$0xff]  ;;  %v468_v31 = vld [vmem:[%s1000_s2 + $0x38] sm:$0xff]  ;;  %v467_v32 = vld [vmem:[%s1000_s2 + $0x30] sm:$0xff] }
  0x1a   :  { %96 = vperm.xlu1 %722, %v49_v17   ;;  %677 = vmatprep.subr.bf16.mxu0 %v727_v19  ;;  %v470_v33 = vld [vmem:[%s1000_s2 + $0x48] sm:$0xff]  ;;  %v469_v34 = vld [vmem:[%s1000_s2 + $0x40] sm:$0xff]  ;;  %v472_v35 = vld [vmem:[%s1000_s2 + $0x58] sm:$0xff] }
  0x1b   :  { %91 = vperm.xlu0 %721, %v48_v18   ;;  %705 = vmatprep.subr.bf16.mxu1 %v727_v19  ;;  %v471_v36 = vld [vmem:[%s1000_s2 + $0x50] sm:$0xff]  ;;  %v474_v37 = vld [vmem:[%s1000_s2 + $0x68] sm:$0xff]  ;;  %v473_v38 = vld [vmem:[%s1000_s2 + $0x60] sm:$0xff] }
  0x1c   :  { %v476_v39 = vld [vmem:[%s1000_s2 + $0x78] sm:$0xff]  ;;  %v475_v40 = vld [vmem:[%s1000_s2 + $0x70] sm:$0xff]  ;;  %v944_v41 = vld [vmem:[%s999_s1] ss:$0 sm:$0xff] }
  0x1d   :  { %678 = vmatpush3.bf16.msra.mxu0 %v727_v19  ;;  %713 = vmatpush3.bf16.msra.mxu1 %v727_v19  ;;  %v649_v54 = vld [vmem:[%s1001_s3 + $0x20] sm:$0xff]   ;;  %v646_v1 = vld [vmem:[%s1001_s3 + $0x8] sm:$0xff]  }
  0x1e   :  { %136 = vperm.xlu1 %722, %v57_v20   ;;  %679 = vmatprep.subr.bf16.mxu0 %v728_v22  ;;  %v615_v57 = vld [vmem:[%s1001_s3] sm:$0xff]   ;;  %v632_v60 = vunpack.c.l.bf16 %v649_v54  ;;  %v633_v61 = vunpack.c.h.bf16 %v649_v54  ;;  %v621_v11 = vunpack.c.h.bf16 %v646_v1  ;;  %v620_v14 = vunpack.c.l.bf16 %v646_v1  ;;  %v650_v15 = vld [vmem:[%s1001_s3 + $0x28] sm:$0xff]  }
  0x1f   :  { %131 = vperm.xlu0 %721, %v56_v21   ;;  %706 = vmatprep.subr.bf16.mxu1 %v728_v22  ;;  %v616_v63 = vunpack.c.l.bf16 %v615_v57  ;;  %v617_v0 = vunpack.c.h.bf16 %v615_v57 }
  0x21   :  { %680 = vmatpush3.bf16.msra.mxu0 %v728_v22  ;;  %714 = vmatpush3.bf16.msra.mxu1 %v728_v22 }
  0x22   :  { %484 = vperm.xlu1 %722, %v462_v23   ;;  %681 = vmatprep.subr.bf16.mxu0 %v729_v25 }
  0x23   :  { %479 = vperm.xlu0 %721, %v461_v24   ;;  %707 = vmatprep.subr.bf16.mxu1 %v729_v25 }
  0x25   :  { %682 = vmatpush3.bf16.msra.mxu0 %v729_v25  ;;  %715 = vmatpush3.bf16.msra.mxu1 %v729_v25  ;;  %v637_v25 = vunpack.c.h.bf16 %v650_v15 }
  0x26   :  { %494 = vperm.xlu1 %722, %v464_v26   ;;  %683 = vmatprep.subr.bf16.mxu0 %v730_v28 }
  0x27   :  { %489 = vperm.xlu0 %721, %v463_v27   ;;  %708 = vmatprep.subr.bf16.mxu1 %v730_v28  ;;  %v636_v27 = vunpack.c.l.bf16 %v650_v15 }
  0x29   :  { %684 = vmatpush3.bf16.msra.mxu0 %v730_v28  ;;  %716 = vmatpush3.bf16.msra.mxu1 %v730_v28  ;;  %v647_v28 = vld [vmem:[%s1001_s3 + $0x10] sm:$0xff]  }
  0x2a   :  { %504 = vperm.xlu1 %722, %v466_v29  }
  0x2b   :  { %499 = vperm.xlu0 %721, %v465_v30  }
  0x2e   :  { %514 = vperm.xlu1 %722, %v468_v31  }
  0x2f   :  { %509 = vperm.xlu0 %721, %v467_v32  }
  0x32   :  { %524 = vperm.xlu1 %722, %v470_v33  }
  0x33   :  { %519 = vperm.xlu0 %721, %v469_v34  }
  0x36   :  { %534 = vperm.xlu1 %722, %v472_v35  }
  0x37   :  { %529 = vperm.xlu0 %721, %v471_v36  }
  0x3a   :  { %544 = vperm.xlu1 %722, %v474_v37   ;;  %v625_v37 = vunpack.c.h.bf16 %v647_v28 }
  0x3b   :  { %539 = vperm.xlu0 %721, %v473_v38  }
  0x3e   :  { %554 = vperm.xlu1 %722, %v476_v39   ;;  %v624_v39 = vunpack.c.l.bf16 %v647_v28 }
  0x3f   :  { %549 = vperm.xlu0 %721, %v475_v40   ;;  %v651_v40 = vld [vmem:[%s1001_s3 + $0x30] sm:$0xff]  }
  0x81   :  { %v102_v42 = vpop.permute.xlu1 %101 }
  0x82   :  { %v62_v43 = vpop.permute.xlu0 %61  ;;  %v153_v44 = vadd.f32 %v944_v41, %v102_v42 }
  0x83   :  { %v145_v45 = vadd.f32 %v944_v41, %v62_v43 }
  0x84   :  { %731 = vtanh.f32 %v153_v44 }
  0x85   :  { %v107_v46 = vpop.permute.xlu1 %106  ;;  %733 = vtanh.f32 %v145_v45 }
  0x86   :  { %v67_v47 = vpop.permute.xlu0 %66  ;;  %v154_v48 = vadd.f32 %v944_v41, %v107_v46 }
  0x87   :  { %v146_v49 = vadd.f32 %v944_v41, %v67_v47 }
  0x88   :  { %735 = vtanh.f32 %v154_v48 }
  0x89   :  { %737 = vtanh.f32 %v146_v49  ;;  %v77_v50 = vpop.permute.xlu1 %76 }
  0x8a   :  { %v72_v51 = vpop.permute.xlu0 %71  ;;  %v148_v52 = vadd.f32 %v944_v41, %v77_v50  ;;  %v641_v50 = vunpack.c.h.bf16 %v651_v40 }
  0x8b   :  { %v147_v53 = vadd.f32 %v944_v41, %v72_v51 }
  0x8c   :  { %739 = vtanh.f32 %v148_v52  ;;  %v640_v52 = vunpack.c.l.bf16 %v651_v40 }
  0x8d   :  { %741 = vtanh.f32 %v147_v53  ;;  %v117_v55 = vpop.permute.xlu1 %116  ;;  %v648_v53 = vld [vmem:[%s1001_s3 + $0x18] sm:$0xff]  }
  0x8e   :  { %v112_v56 = vpop.permute.xlu0 %111  ;;  %v156_v58 = vadd.f32 %v944_v41, %v117_v55  ;;  %v732_v62 = vpop.eup %731 }
  0x8f   :  { %v155_v59 = vadd.f32 %v944_v41, %v112_v56  ;;  %v734_v2 = vpop.eup %733  ;;  %v217_v9 = vmul.f32 %v732_v62, %v632_v60  ;;  %v652_v60 = vld [vmem:[%s1001_s3 + $0x38] sm:$0xff]   ;;  %s788_s3 = smov [#allocation3]  }
  0x90   :  { %743 = vtanh.f32 %v156_v58  ;;  %v209_v12 = vmul.f32 %v734_v2, %v616_v63  ;;  %v629_v58 = vunpack.c.h.bf16 %v648_v53  ;;  %v645_v1 = vunpack.c.h.bf16 %v652_v60  ;;  %s594_s10 = sshll.u32 %s788_s3, 4  ;;  %s595_s10 = int_to_ptr.vmem [resolvable:$true] %s594_s10 }
  0x91   :  { %745 = vtanh.f32 %v155_v59  ;;  %v87_v3 = vpop.permute.xlu1 %86  ;;  %v628_v59 = vunpack.c.l.bf16 %v648_v53  ;;  %s763_s11 = scalar_lea.vmem %s595_s10, 2048  ;;  %p768_p1 = scmp.lt.s32.totalorder %s595_s10, %s595_s10 }
  0x92   :  { %v82_v4 = vpop.permute.xlu0 %81  ;;  %v736_v5 = vpop.eup %735  ;;  %v150_v6 = vadd.f32 %v944_v41, %v87_v3  ;;  %v644_v3 = vunpack.c.l.bf16 %v652_v60  ;;  %p764_p0 = scmp.ne.s32.totalorder %s595_s10, %s763_s11  ;;  %p769_p2 = scmp.lt.s32.totalorder %s763_s11, %s763_s11 }
  0x93   :  { %v149_v7 = vadd.f32 %v944_v41, %v82_v4  ;;  %v738_v8 = vpop.eup %737  ;;  %v218_v10 = vmul.f32 %v736_v5, %v633_v61 }
  0x94   :  { %747 = vtanh.f32 %v150_v6  ;;  %v210_v13 = vmul.f32 %v738_v8, %v617_v0  ;;  %p770_p3 = por %p769_p2, %p768_p1 }
  0x95   :  { %749 = vtanh.f32 %v149_v7  ;;  %v127_v16 = vpop.permute.xlu1 %126  ;;  %v229_v18 = vpack.c.bf16 %v218_v10, %v217_v9 }
  0x96   :  { %v122_v17 = vpop.permute.xlu0 %121  ;;  %v740_v19 = vpop.eup %739  ;;  %v158_v20 = vadd.f32 %v944_v41, %v127_v16  ;;  %v225_v22 = vpack.c.bf16 %v210_v13, %v209_v12  ;;  %p771_p4 = pnand %p770_p3, %p764_p0 }
  0x97   :  { %v157_v21 = vadd.f32 %v944_v41, %v122_v17  ;;  %v742_v23 = vpop.eup %741  ;;  %693 = vmatprep.mubr.bf16.mxu1 %v229_v18  ;;  %v212_v24 = vmul.f32 %v740_v19, %v621_v11 }
  0x98   :  { %751 = vtanh.f32 %v158_v20  ;;  %685 = vmatprep.mubr.bf16.mxu0 %v225_v22  ;;  %v211_v26 = vmul.f32 %v742_v23, %v620_v14 }
  0x99   :  { %753 = vtanh.f32 %v157_v21  ;;  %v97_v29 = vpop.permute.xlu1 %96 }
  0x9a   :  { %v92_v30 = vpop.permute.xlu0 %91  ;;  %v744_v31 = vpop.eup %743  ;;  %v152_v32 = vadd.f32 %v944_v41, %v97_v29  ;;  %v226_v34 = vpack.c.bf16 %v212_v24, %v211_v26 }
  0x9b   :  { %v151_v33 = vadd.f32 %v944_v41, %v92_v30  ;;  %v746_v35 = vpop.eup %745  ;;  %v220_v36 = vmul.f32 %v744_v31, %v637_v25 }
  0x9c   :  { %755 = vtanh.f32 %v152_v32  ;;  %686 = vmatmul.mubr.bf16.vlgmr.msra.gmra.mrb[0].mxu0 %v226_v34  ;;  %v219_v38 = vmul.f32 %v746_v35, %v636_v27 }
  0x9d   :  { %757 = vtanh.f32 %v151_v33  ;;  %v137_v42 = vpop.permute.xlu1 %136 }
  0x9e   :  { %v132_v43 = vpop.permute.xlu0 %131  ;;  %v748_v44 = vpop.eup %747  ;;  %v160_v45 = vadd.f32 %v944_v41, %v137_v42  ;;  %v230_v47 = vpack.c.bf16 %v220_v36, %v219_v38 }
  0x9f   :  { %v159_v46 = vadd.f32 %v944_v41, %v132_v43  ;;  %v750_v48 = vpop.eup %749  ;;  %v214_v49 = vmul.f32 %v748_v44, %v625_v37 }
  0xa0   :  { %759 = vtanh.f32 %v160_v45  ;;  %694 = vmatmul.mubr.bf16.vlgmr.msra.gmra.mrb[0].mxu1 %v230_v47  ;;  %v213_v51 = vmul.f32 %v750_v48, %v624_v39 }
  0xa1   :  { %761 = vtanh.f32 %v159_v46  ;;  %v485_v11 = vpop.permute.xlu1 %484 }
  0xa2   :  { %v752_v54 = vpop.eup %751  ;;  %v227_v55 = vpack.c.bf16 %v214_v49, %v213_v51  ;;  %v480_v10 = vpop.permute.xlu0 %479 }
  0xa3   :  { %v754_v56 = vpop.eup %753  ;;  %v222_v57 = vmul.f32 %v752_v54, %v641_v50 }
  0xa4   :  { %689 = vmatprep.mubr.bf16.mxu0 %v227_v55  ;;  %v221_v41 = vmul.f32 %v754_v56, %v640_v52 }
  0xa5   :  { %v495_v13 = vpop.permute.xlu1 %494 }
  0xa6   :  { %v756_v61 = vpop.eup %755  ;;  %v231_v62 = vpack.c.bf16 %v222_v57, %v221_v41  ;;  %v490_v12 = vpop.permute.xlu0 %489 }
  0xa7   :  { %v758_v63 = vpop.eup %757  ;;  %v216_v0 = vmul.f32 %v756_v61, %v629_v58 }
  0xa8   :  { %697 = vmatprep.mubr.bf16.mxu1 %v231_v62  ;;  %v215_v2 = vmul.f32 %v758_v63, %v628_v59 }
  0xa9   :  { %v505_v15 = vpop.permute.xlu1 %504 }
  0xaa   :  { %v760_v4 = vpop.eup %759  ;;  %v228_v5 = vpack.c.bf16 %v216_v0, %v215_v2  ;;  %v500_v14 = vpop.permute.xlu0 %499 }
  0xab   :  { %v762_v6 = vpop.eup %761  ;;  %v224_v7 = vmul.f32 %v760_v4, %v645_v1 }
  0xac   :  { %690 = vmatmul.mubr.bf16.gmra.mrb[4].mxu0 %v228_v5  ;;  %v223_v8 = vmul.f32 %v762_v6, %v644_v3 }
  0xad   :  { %v515_v17 = vpop.permute.xlu1 %514 }
  0xae   :  { %v232_v9 = vpack.c.bf16 %v224_v7, %v223_v8  ;;  %v510_v16 = vpop.permute.xlu0 %509 }
  0xb0   :  { %698 = vmatmul.mubr.bf16.gmra.mrb[4].mxu1 %v232_v9 }
  0xb1   :  { %v525_v19 = vpop.permute.xlu1 %524 }
  0xb2   :  { %v520_v18 = vpop.permute.xlu0 %519 }
  0xb5   :  { %v535_v32 = vpop.permute.xlu1 %534 }
  0xb6   :  { %v530_v27 = vpop.permute.xlu0 %529 }
  0xb9   :  { %v545_v39 = vpop.permute.xlu1 %544 }
  0xba   :  { %v540_v38 = vpop.permute.xlu0 %539 }
  0xbd   :  { %v555_v53 = vpop.permute.xlu1 %554 }
  0xbe   :  { %v550_v48 = vpop.permute.xlu0 %549 }
 0x16f   :  { %v687_v20 = vpop.f32.mrb[0].mxu0 }
 0x170   :  { %v559_v21 = vmul.f32 %v687_v20, %v490_v12  ;;  %v347_v22 = vpop.f32.mrb[1].mxu0 }
 0x171   :  { %v557_v23 = vmul.f32 %v480_v10, %v347_v22  ;;  %v688_v24 = vpop.f32.mrb[2].mxu0 }
 0x172   :  { %575 = vst [vmem:[#allocation3 + $0x10] sm:$0xff] %v559_v21  ;;  %v560_v25 = vmul.f32 %v688_v24, %v495_v13  ;;  %v350_v26 = vpop.f32.mrb[3].mxu0 }
 0x173   :  { %573 = vst [vmem:[#allocation3] sm:$0xff] %v557_v23  ;;  %v558_v28 = vmul.f32 %v485_v11, %v350_v26  ;;  %v695_v29 = vpop.f32.mrb[0].mxu1 }
 0x174   :  { %576 = vst [vmem:[#allocation3 + $0x18] sm:$0xff] %v560_v25  ;;  %v567_v30 = vmul.f32 %v695_v29, %v530_v27  ;;  %v379_v31 = vpop.f32.mrb[1].mxu1 }
 0x175   :  { %574 = vst [vmem:[#allocation3 + $0x8] sm:$0xff] %v558_v28  ;;  %v565_v33 = vmul.f32 %v520_v18, %v379_v31  ;;  %v696_v34 = vpop.f32.mrb[2].mxu1 }
 0x176   :  { %583 = vst [vmem:[#allocation3 + $0x50] sm:$0xff] %v567_v30  ;;  %v568_v35 = vmul.f32 %v696_v34, %v535_v32  ;;  %v382_v36 = vpop.f32.mrb[3].mxu1 }
 0x177   :  { %581 = vst [vmem:[#allocation3 + $0x40] sm:$0xff] %v565_v33  ;;  %v566_v37 = vmul.f32 %v525_v19, %v382_v36 }
 0x178   :  { %584 = vst [vmem:[#allocation3 + $0x58] sm:$0xff] %v568_v35 }
 0x179   :  { %582 = vst [vmem:[#allocation3 + $0x48] sm:$0xff] %v566_v37 }
 0x17f   :  { %v691_v40 = vpop.f32.mrb[4].mxu0 }
 0x180   :  { %v563_v42 = vmul.f32 %v691_v40, %v510_v16  ;;  %v363_v43 = vpop.f32.mrb[5].mxu0 }
 0x181   :  { %v561_v44 = vmul.f32 %v500_v14, %v363_v43  ;;  %v692_v45 = vpop.f32.mrb[6].mxu0 }
 0x182   :  { %579 = vst [vmem:[#allocation3 + $0x30] sm:$0xff] %v563_v42  ;;  %v564_v46 = vmul.f32 %v692_v45, %v515_v17  ;;  %v366_v47 = vpop.f32.mrb[7].mxu0 }
 0x183   :  { %577 = vst [vmem:[#allocation3 + $0x20] sm:$0xff] %v561_v44  ;;  %v562_v49 = vmul.f32 %v505_v15, %v366_v47  ;;  %v699_v50 = vpop.f32.mrb[4].mxu1 }
 0x184   :  { %580 = vst [vmem:[#allocation3 + $0x38] sm:$0xff] %v564_v46  ;;  %v571_v51 = vmul.f32 %v699_v50, %v550_v48  ;;  %v395_v52 = vpop.f32.mrb[5].mxu1 }
 0x185   :  { %578 = vst [vmem:[#allocation3 + $0x28] sm:$0xff] %v562_v49  ;;  %v569_v54 = vmul.f32 %v540_v38, %v395_v52  ;;  %v700_v55 = vpop.f32.mrb[6].mxu1 }
 0x186   :  { %587 = vst [vmem:[#allocation3 + $0x70] sm:$0xff] %v571_v51  ;;  %v572_v56 = vmul.f32 %v700_v55, %v555_v53  ;;  %v398_v57 = vpop.f32.mrb[7].mxu1 }
 0x187   :  { %585 = vst [vmem:[#allocation3 + $0x60] sm:$0xff] %v569_v54  ;;  %v570_v58 = vmul.f32 %v545_v39, %v398_v57 }
 0x188   :  { %588 = vst [vmem:[#allocation3 + $0x78] sm:$0xff] %v572_v56 }
 0x189   :  { %586 = vst [vmem:[#allocation3 + $0x68] sm:$0xff] %v570_v58 }
 0x18a   :  { %774 = shalt.err (!%p771_p4)
}
 0x18b   :  { %s775_s14 = scalar_lea.hbm %s1003_s5, 2048 }
 0x18c   :  { %p776_p5 = scmp.ne.s32.totalorder %s1003_s5, %s775_s14  ;;  %p779_p6 = scmp.lt.u32.totalorder %s775_s14, %s1003_s5 }
 0x18e   :  { %p781_p7 = pnand %p779_p6, %p776_p5 }
 0x190   :  { %784 = shalt.err (!%p781_p7)
}
 0x191   :  { %s789_s18 = smov 128   ;;  %s790_s19 = smov 8  }
 0x192   :  { %600 = dma.vmem_to_hbm [thread:$0]  %s595_s10, 2048, %s1003_s5, [#allocation4], %s789_s18, %s789_s18, %s790_s19  }
 0x193   :  { %785 = dma.done.wait [#allocation4], 2048  }
 0x194   :  { %786 = vsyncadd [#allocation4], 4294965248 }
 0x195   :  { %604 = vsyncpa [#allocation4], 1 }

</bundles_post_ra>
